<compile_context>
chip_gen: v7x
topology: tpu7x:2x2x1
jax: 0.10.0
libtpu: 0.0.40
codegen_flags: <defaults>
</compile_context>

<pallas_src>
import functools

import jax
import jax.numpy as jnp
from jax.experimental import pallas as pl
from jax.experimental.pallas import tpu as pltpu

LANE = 128          # lane width: output dims padded to a multiple of this
DEFAULT_TILE_B = 512  # batch tile (>=512 rows reaches ~85% of HBM roofline)


def _round_up(n: int, m: int) -> int:
    return ((n + m - 1) // m) * m


def _mlp_hook_kernel(x_ref, w1_ref, b1_ref, w2_ref, b2_ref, out_ref, hook_ref):
    # x tile: (TILE_B, D_in) f32 -> bf16 only as MXU input (f32 accumulation).
    x = x_ref[...].astype(jnp.bfloat16)

    # fc1 (the hooked layer). Bias add in f32.
    h = jnp.dot(x, w1_ref[...], preferred_element_type=jnp.float32) + b1_ref[...]

    # Forward-hook capture: selected_out = fc1 output (pre-ReLU), lane-dense store.
    hook_ref[...] = h.astype(hook_ref.dtype)

    # ReLU in f32 (keep elementwise math off bf16 for v5e).
    a = jnp.maximum(h, 0.0)

    # fc2, again bf16 MXU inputs, f32 accumulation, f32 bias add.
    o = (jnp.dot(a.astype(jnp.bfloat16), w2_ref[...],
                 preferred_element_type=jnp.float32) + b2_ref[...])
    out_ref[...] = o.astype(out_ref.dtype)


def make_model_with_hook(w1, b1, w2, b2, *, tile_b=DEFAULT_TILE_B):
    """Build forward(x) -> (out, selected_out), matching ModelWithHook.forward.

    w1: (H, D_in), b1: (H,)      -- fc1, the hooked layer (torch (out, in) layout)
    w2: (D_out, H), b2: (D_out,) -- fc2

    All parameter reshaping / transposition / padding / bf16 casting happens
    HERE, once, not on the per-call forward path.
    """
    H, D_in = w1.shape
    D_out = w2.shape[0]
    H_pad = _round_up(H, LANE)
    D_out_pad = _round_up(D_out, LANE)

    # Pre-transposed, zero-padded, bf16 matmul operands; f32 biases.
    w1_t = (jnp.zeros((D_in, H_pad), jnp.bfloat16)
            .at[:, :H].set(w1.T.astype(jnp.bfloat16)))
    b1_p = jnp.zeros((1, H_pad), jnp.float32).at[:, :H].set(b1.astype(jnp.float32))
    w2_t = (jnp.zeros((H_pad, D_out_pad), jnp.bfloat16)
            .at[:H, :D_out].set(w2.T.astype(jnp.bfloat16)))
    b2_p = (jnp.zeros((1, D_out_pad), jnp.float32)
            .at[:, :D_out].set(b2.astype(jnp.float32)))

    @jax.jit
    def forward(x):
        B, d_in = x.shape
        assert d_in == D_in
        # Batch tile: whole batch if small, else 512-row tiles (multiple of 8,
        # partial last block handled by masked writeback; batch is not a
        # contraction dim so garbage OOB rows never contaminate valid rows).
        tb = B if B <= tile_b else tile_b
        grid = (pl.cdiv(B, tb),)

        out_p, hook_p = pl.pallas_call(
            _mlp_hook_kernel,
            out_shape=(
                jax.ShapeDtypeStruct((B, D_out_pad), x.dtype),  # model(x), padded
                jax.ShapeDtypeStruct((B, H_pad), x.dtype),      # selected_out, padded
            ),
            grid_spec=pltpu.PrefetchScalarGridSpec(
                num_scalar_prefetch=0,
                grid=grid,
                in_specs=[
                    pl.BlockSpec((tb, D_in), lambda i: (i, 0)),          # x tile
                    pl.BlockSpec((D_in, H_pad), lambda i: (0, 0)),       # w1_t (resident)
                    pl.BlockSpec((1, H_pad), lambda i: (0, 0)),          # b1   (resident)
                    pl.BlockSpec((H_pad, D_out_pad), lambda i: (0, 0)),  # w2_t (resident)
                    pl.BlockSpec((1, D_out_pad), lambda i: (0, 0)),      # b2   (resident)
                ],
                out_specs=(
                    pl.BlockSpec((tb, D_out_pad), lambda i: (i, 0)),
                    pl.BlockSpec((tb, H_pad), lambda i: (i, 0)),
                ),
            ),
            compiler_params=pltpu.CompilerParams(
                dimension_semantics=("parallel",),   # shard batch over v7x's 2 TCs
            ),
        )(x, w1_t, b1_p, w2_t, b2_p)

        # Strip the lane padding (fuses into the jitted forward).
        return out_p[:, :D_out], hook_p[:, :H]

    return forward


def _init_linear(key, out_features, in_features):
    # Deterministic torch-style Linear init: U(-1/sqrt(fan_in), 1/sqrt(fan_in)).
    kw, kb = jax.random.split(key)
    bound = 1.0 / jnp.sqrt(jnp.float32(in_features))
    w = jax.random.uniform(kw, (out_features, in_features), jnp.float32,
                           minval=-bound, maxval=bound)
    b = jax.random.uniform(kb, (out_features,), jnp.float32,
                           minval=-bound, maxval=bound)
    return w, b


if __name__ == "__main__":
    B, D_in, H, D_out = 8, 32, 64, 16

    root = jax.random.PRNGKey(0)
    kx, k1, k2 = jax.random.split(root, 3)

    x = jax.random.normal(kx, (B, D_in), jnp.float32)
    w1, b1 = _init_linear(k1, H, D_in)     # fc1 (hooked layer)
    w2, b2 = _init_linear(k2, D_out, H)    # fc2

    forward = make_model_with_hook(w1, b1, w2, b2)
    out, selected_out = forward(x)
    jax.block_until_ready((out, selected_out))

    # Reference following the same numerics (bf16 MXU inputs, f32 accumulation).
    xb = x.astype(jnp.bfloat16)
    h_ref = jnp.dot(xb, w1.T.astype(jnp.bfloat16),
                    preferred_element_type=jnp.float32) + b1
    a_ref = jnp.maximum(h_ref, 0.0)
    out_ref = jnp.dot(a_ref.astype(jnp.bfloat16), w2.T.astype(jnp.bfloat16),
                      preferred_element_type=jnp.float32) + b2

    assert out.shape == (B, D_out) and selected_out.shape == (B, H)
    assert jnp.allclose(out, out_ref, atol=1e-4, rtol=1e-4)
    assert jnp.allclose(selected_out, h_ref, atol=1e-4, rtol=1e-4)

    # Sanity check against the pure-f32 math (bf16 input quantization only).
    h_f32 = x @ w1.T + b1
    out_f32 = jnp.maximum(h_f32, 0.0) @ w2.T + b2
    assert jnp.allclose(out, out_f32, atol=5e-2, rtol=5e-2)
    assert jnp.allclose(selected_out, h_f32, atol=5e-2, rtol=5e-2)

    print("KERNEL_OK")
</pallas_src>

<mosaic_0001>
module attributes {stable_mosaic.version = 11 : i64} {
  func.func @_mlp_hook_kernel(%arg0: i32, %arg1: memref<8x32xf32, #tpu.memory_space<vmem>>, %arg2: memref<32x128xbf16, #tpu.memory_space<vmem>>, %arg3: memref<1x128xf32, #tpu.memory_space<vmem>>, %arg4: memref<128x128xbf16, #tpu.memory_space<vmem>>, %arg5: memref<1x128xf32, #tpu.memory_space<vmem>>, %arg6: memref<8x128xf32, #tpu.memory_space<vmem>>, %arg7: memref<8x128xf32, #tpu.memory_space<vmem>>) attributes {dimension_semantics = [#tpu.dimension_semantics<parallel>], iteration_bounds = array<i64: 1>, scalar_prefetch = 0 : i64, scratch_operands = 0 : i64, tpu.core_type = #tpu.core_type<tc>, window_params = [{transform_indices = @transform_0, window_bounds = array<i64: 8, 32>}, {pipeline_mode = #tpu.pipeline_mode<synchronous>, transform_indices = @transform_1, window_bounds = array<i64: 32, 128>}, {pipeline_mode = #tpu.pipeline_mode<synchronous>, transform_indices = @transform_2, window_bounds = array<i64: 1, 128>}, {pipeline_mode = #tpu.pipeline_mode<synchronous>, transform_indices = @transform_3, window_bounds = array<i64: 128, 128>}, {pipeline_mode = #tpu.pipeline_mode<synchronous>, transform_indices = @transform_4, window_bounds = array<i64: 1, 128>}, {transform_indices = @transform_5, window_bounds = array<i64: 8, 128>}, {transform_indices = @transform_6, window_bounds = array<i64: 8, 128>}]} {
    %c0 = arith.constant 0 : index
    %c0_0 = arith.constant 0 : index
    %0 = vector.load %arg1[%c0, %c0_0] : memref<8x32xf32, #tpu.memory_space<vmem>>, vector<8x32xf32>
    %1 = arith.truncf %0 : vector<8x32xf32> to vector<8x32xbf16>
    %c0_1 = arith.constant 0 : index
    %c0_2 = arith.constant 0 : index
    %2 = vector.load %arg2[%c0_1, %c0_2] : memref<32x128xbf16, #tpu.memory_space<vmem>>, vector<32x128xbf16>
    %cst = arith.constant dense<0.000000e+00> : vector<8x128xf32>
    %3 = tpu.matmul %1, %2, %cst {dimension_numbers = #tpu.dot_dimension_numbers<[1], [0], [0], [1], [0, 0, 1, 1], [], []>} : vector<8x32xbf16>, vector<32x128xbf16>, vector<8x128xf32> -> vector<8x128xf32>
    %c0_3 = arith.constant 0 : index
    %c0_4 = arith.constant 0 : index
    %4 = vector.load %arg3[%c0_3, %c0_4] : memref<1x128xf32, #tpu.memory_space<vmem>>, vector<1x128xf32>
    %5 = vector.broadcast %4 : vector<1x128xf32> to vector<8x128xf32>
    %6 = arith.addf %3, %5 : vector<8x128xf32>
    %c0_5 = arith.constant 0 : index
    %c0_6 = arith.constant 0 : index
    %7 = vector.load %arg7[%c0_5, %c0_6] : memref<8x128xf32, #tpu.memory_space<vmem>>, vector<8x128xf32>
    tpu.vector_store %arg7[%c0_5, %c0_6], %6 {strides = array<i32>} : memref<8x128xf32, #tpu.memory_space<vmem>>, vector<8x128xf32>,
    %cst_7 = arith.constant 0.000000e+00 : f32
    %8 = vector.broadcast %cst_7 : f32 to vector<8x128xf32>
    %9 = arith.maximumf %6, %8 : vector<8x128xf32>
    %10 = arith.truncf %9 : vector<8x128xf32> to vector<8x128xbf16>
    %c0_8 = arith.constant 0 : index
    %c0_9 = arith.constant 0 : index
    %11 = vector.load %arg4[%c0_8, %c0_9] : memref<128x128xbf16, #tpu.memory_space<vmem>>, vector<128x128xbf16>
    %cst_10 = arith.constant dense<0.000000e+00> : vector<8x128xf32>
    %12 = tpu.matmul %10, %11, %cst_10 {dimension_numbers = #tpu.dot_dimension_numbers<[1], [0], [0], [1], [0, 0, 1, 1], [], []>} : vector<8x128xbf16>, vector<128x128xbf16>, vector<8x128xf32> -> vector<8x128xf32>
    %c0_11 = arith.constant 0 : index
    %c0_12 = arith.constant 0 : index
    %13 = vector.load %arg5[%c0_11, %c0_12] : memref<1x128xf32, #tpu.memory_space<vmem>>, vector<1x128xf32>
    %14 = vector.broadcast %13 : vector<1x128xf32> to vector<8x128xf32>
    %15 = arith.addf %12, %14 : vector<8x128xf32>
    %c0_13 = arith.constant 0 : index
    %c0_14 = arith.constant 0 : index
    %16 = vector.load %arg6[%c0_13, %c0_14] : memref<8x128xf32, #tpu.memory_space<vmem>>, vector<8x128xf32>
    tpu.vector_store %arg6[%c0_13, %c0_14], %15 {strides = array<i32>} : memref<8x128xf32, #tpu.memory_space<vmem>>, vector<8x128xf32>,
    return
  }
  func.func @transform_0(%arg0: i32) -> (i32, i32) {
    %c0_i32 = arith.constant 0 : i32
    %c0_i32_0 = arith.constant 0 : i32
    return %arg0, %c0_i32 : i32, i32
  }
  func.func @transform_1(%arg0: i32) -> (i32, i32) {
    %c0_i32 = arith.constant 0 : i32
    %c0_i32_0 = arith.constant 0 : i32
    %c0_i32_1 = arith.constant 0 : i32
    return %c0_i32, %c0_i32_0 : i32, i32
  }
  func.func @transform_2(%arg0: i32) -> (i32, i32) {
    %c0_i32 = arith.constant 0 : i32
    %c0_i32_0 = arith.constant 0 : i32
    %c0_i32_1 = arith.constant 0 : i32
    return %c0_i32, %c0_i32_0 : i32, i32
  }
  func.func @transform_3(%arg0: i32) -> (i32, i32) {
    %c0_i32 = arith.constant 0 : i32
    %c0_i32_0 = arith.constant 0 : i32
    %c0_i32_1 = arith.constant 0 : i32
    return %c0_i32, %c0_i32_0 : i32, i32
  }
  func.func @transform_4(%arg0: i32) -> (i32, i32) {
    %c0_i32 = arith.constant 0 : i32
    %c0_i32_0 = arith.constant 0 : i32
    %c0_i32_1 = arith.constant 0 : i32
    return %c0_i32, %c0_i32_0 : i32, i32
  }
  func.func @transform_5(%arg0: i32) -> (i32, i32) {
    %c0_i32 = arith.constant 0 : i32
    %c0_i32_0 = arith.constant 0 : i32
    return %arg0, %c0_i32 : i32, i32
  }
  func.func @transform_6(%arg0: i32) -> (i32, i32) {
    %c0_i32 = arith.constant 0 : i32
    %c0_i32_0 = arith.constant 0 : i32
    return %arg0, %c0_i32 : i32, i32
  }
}

</mosaic_0001>

<bundles_post_ra>
// kernel: forward.1
= control target key start
LH: loop header
LB: loop body
LE: loop exit
PB: predicated region body
PF: predicated region fallthrough
CT: control target
= control target key end

     0   :  { %12 = vsyncpa [#allocation3], 0  ;;  %s542_s0 = inlined_call_operand.hbm [shape: f32[8,32], index: 0, kind: input, shape index: {}]   ;;  %s543_s1 = inlined_call_operand.vmem [shape: bf16[32,128], index: 1, kind: input, shape index: {}]   ;;  %s544_s2 = inlined_call_operand.vmem [shape: f32[1,128], index: 2, kind: input, shape index: {}]   ;;  %s545_s3 = inlined_call_operand.hbm [shape: bf16[128,128], index: 3, kind: input, shape index: {}]   ;;  %s546_s4 = inlined_call_operand.vmem [shape: f32[1,128], index: 4, kind: input, shape index: {}]   ;;  %s547_s5 = inlined_call_operand.hbm [shape: f32[8,128], index: 5, kind: output, shape index: {0}]   ;;  %s548_s6 = inlined_call_operand.hbm [shape: f32[8,128], index: 6, kind: output, shape index: {1}]  }
   0x1   :  { %13 = vsyncpa [#allocation6], 0 }
   0x2   :  { %14 = vsyncpa [#allocation4], 0 }
   0x3   :  { %15 = vsyncpa [#allocation9], 0  ;;  %s432_s21 = smov [#allocation2]   ;;  %s433_s23 = smov [#allocation5]  }
   0x4   :  { %s22_s22 = sshll.u32 %s432_s21, 4  ;;  %s35_s24 = sshll.u32 %s433_s23, 4  ;;  %s23_s22 = int_to_ptr.vmem [resolvable:$true] %s22_s22  ;;  %s475_s24 = int_to_ptr.vmem [resolvable:$true] %s35_s24 }
   0x5   :  { %s336_s27 = scalar_lea.hbm %s542_s0, 128 }
   0x6   :  { %p337_p0 = scmp.ne.s32.totalorder %s542_s0, %s336_s27  ;;  %p340_p1 = scmp.lt.u32.totalorder %s336_s27, %s542_s0 }
   0x8   :  { %p342_p2 = pnand %p340_p1, %p337_p0 }
   0xa   :  { %345 = shalt.err (!%p342_p2)
}
   0xb   :  { %s346_s8 = scalar_lea.vmem %s23_s22, 128  ;;  %p351_p4 = scmp.lt.s32.totalorder %s23_s22, %s23_s22 }
   0xc   :  { %p347_p3 = scmp.ne.s32.totalorder %s23_s22, %s346_s8  ;;  %p352_p5 = scmp.lt.s32.totalorder %s346_s8, %s346_s8 }
   0xe   :  { %p353_p6 = por %p352_p5, %p351_p4 }
  0x10   :  { %p354_p7 = pnand %p353_p6, %p347_p3 }
  0x12   :  { %357 = shalt.err (!%p354_p7)
}
  0x13   :  { %25 = dma.hbm_to_vmem [thread:$0]  %s542_s0, 128, %s23_s22, [#allocation3]  }
  0x14   :  { %s358_s13 = scalar_lea.hbm %s545_s3, 1024 }
  0x15   :  { %p359_p8 = scmp.ne.s32.totalorder %s545_s3, %s358_s13  ;;  %p362_p9 = scmp.lt.u32.totalorder %s358_s13, %s545_s3 }
  0x17   :  { %p364_p10 = pnand %p362_p9, %p359_p8 }
  0x19   :  { %367 = shalt.err (!%p364_p10)
}
  0x1a   :  { %s368_s18 = scalar_lea.vmem %s475_s24, 1024  ;;  %p373_p12 = scmp.lt.s32.totalorder %s475_s24, %s475_s24 }
  0x1b   :  { %p369_p11 = scmp.ne.s32.totalorder %s475_s24, %s368_s18  ;;  %p374_p13 = scmp.lt.s32.totalorder %s368_s18, %s368_s18 }
  0x1d   :  { %p375_p0 = por %p374_p13, %p373_p12 }
  0x1f   :  { %p376_p1 = pnand %p375_p0, %p369_p11 }
  0x21   :  { %379 = shalt.err (!%p376_p1)
}
  0x22   :  { %s434_s0 = smov 64   ;;  %s435_s19 = smov 4  }
  0x23   :  { %41 = dma.hbm_to_vmem [thread:$0]  %s545_s3, 1024, %s475_s24, [#allocation6], %s434_s0, %s434_s0, %s435_s19  }
  0x24   :  { %424 = dma.done.wait [#allocation3], 128  }
  0x25   :  { %425 = vsyncadd [#allocation3], 4294967168 }
  0x26   :  { %426 = dma.done.wait [#allocation6], 1024  }
  0x27   :  { %427 = vsyncadd [#allocation6], 4294966272  ;;  %v436_v0 = vmov 0.0   ;;  %vm437_vm0 = vmmov 0   ;;  %v326_v1 = vld [vmem:[%s543_s1] sm:$0xff]   ;;  %v327_v2 = vld [vmem:[%s543_s1 + $0x8] sm:$0xff]  }
  0x28   :  { %290 = vmatprep.subr.bf16.mxu0 %v436_v0  ;;  %294 = vmatprep.mubr.msk.bf16.mxu0 %vm437_vm0, %v436_v0  ;;  %v51_v3 = vld [vmem:[#allocation2] sm:$0xff]  ;;  %v328_v4 = vld [vmem:[#allocation5] sm:$0xff]   ;;  %v329_v6 = vld [vmem:[#allocation5 + $0x8] sm:$0xff]   ;;  %vm76_vm1 = vcmask 261120   ;;  %s438_s24 = smov [#allocation8]  }
  0x29   :  { %298 = vmatprep.subr.bf16.mxu1 %v436_v0  ;;  %314 = vmatprep.mubr.msk.bf16.mxu1 %vm437_vm0, %v436_v0  ;;  %v52_v5 = vpack.c.bf16 %v51_v3, %v51_v3  ;;  %v330_v7 = vld [vmem:[#allocation5 + $0x10] sm:$0xff]   ;;  %v331_v8 = vld [vmem:[#allocation5 + $0x18] sm:$0xff]   ;;  %v332_v9 = vld [vmem:[#allocation5 + $0x20] sm:$0xff]   ;;  %s251_s27 = sshll.u32 %s438_s24, 4  ;;  %s252_s27 = int_to_ptr.vmem [resolvable:$true] %s251_s27 }
  0x2a   :  { %291 = vmatpush3.bf16.msra.mxu0 %v326_v1  ;;  %299 = vmatpush3.bf16.msra.mxu1 %v328_v4  ;;  %v333_v10 = vld [vmem:[#allocation5 + $0x28] sm:$0xff]   ;;  %v334_v11 = vld [vmem:[#allocation5 + $0x30] sm:$0xff]   ;;  %v335_v12 = vld [vmem:[#allocation5 + $0x38] sm:$0xff]   ;;  %s380_s28 = scalar_lea.vmem %s252_s27, 128  ;;  %p385_p3 = scmp.lt.s32.totalorder %s252_s27, %s252_s27 }
  0x2b   :  { %292 = vmatprep.subr.bf16.mxu0 %v436_v0  ;;  %300 = vmatprep.subr.bf16.mxu1 %v436_v0  ;;  %v265_v13 = vld [vmem:[%s544_s2] ss:$0 sm:$0xff]  ;;  %p381_p2 = scmp.ne.s32.totalorder %s252_s27, %s380_s28  ;;  %p386_p4 = scmp.lt.s32.totalorder %s380_s28, %s380_s28 }
  0x2d   :  { %p387_p5 = por %p386_p4, %p385_p3 }
  0x2e   :  { %293 = vmatpush3.bf16.msra.mxu0 %v327_v2  ;;  %301 = vmatpush3.bf16.msra.mxu1 %v329_v6 }
  0x2f   :  { %302 = vmatprep.subr.bf16.mxu1 %v436_v0  ;;  %p388_p6 = pnand %p387_p5, %p381_p2 }
  0x31   :  { %295 = vmatmul.mubr.msk.bf16.vlgmr.msra.gmra.mrb[0].mxu0 %vm76_vm1, %v52_v5 }
  0x32   :  { %303 = vmatpush3.bf16.msra.mxu1 %v330_v7 }
  0x33   :  { %304 = vmatprep.subr.bf16.mxu1 %v436_v0 }
  0x36   :  { %305 = vmatpush3.bf16.msra.mxu1 %v331_v8 }
  0x37   :  { %306 = vmatprep.subr.bf16.mxu1 %v436_v0 }
  0x3a   :  { %307 = vmatpush3.bf16.msra.mxu1 %v332_v9 }
  0x3b   :  { %308 = vmatprep.subr.bf16.mxu1 %v436_v0 }
  0x3e   :  { %309 = vmatpush3.bf16.msra.mxu1 %v333_v10 }
  0x3f   :  { %310 = vmatprep.subr.bf16.mxu1 %v436_v0 }
  0x42   :  { %311 = vmatpush3.bf16.msra.mxu1 %v334_v11 }
  0x43   :  { %312 = vmatprep.subr.bf16.mxu1 %v436_v0 }
  0x46   :  { %313 = vmatpush3.bf16.msra.mxu1 %v335_v12 }
 0x104   :  { %v114_v14 = vpop.f32.mrb[0].mxu0 }
 0x105   :  { %v115_v15 = vadd.f32 %v265_v13, %v114_v14  ;;  %v296_v16 = vpop.f32.mrb[1].mxu0 }
 0x106   :  { %v117_v17 = vpop.f32.mrb[2].mxu0 }
 0x107   :  { %v121_v18 = vmax.f32 %v115_v15, 0.0  ;;  %120 = vst [vmem:[#allocation8] sm:$0xff] %v115_v15  ;;  %v297_v19 = vpop.f32.mrb[3].mxu0 }
 0x109   :  { %v122_v20 = vpack.c.bf16 %v121_v18, %v121_v18 }
 0x10b   :  { %315 = vmatmul.mubr.bf16.vlgmr.msra.gmra.mrb[0].mxu1 %v122_v20 }
 0x10c   :  { %391 = shalt.err (!%p388_p6)
}
 0x10d   :  { %s392_s30 = scalar_lea.hbm %s548_s6, 128 }
 0x10e   :  { %p393_p7 = scmp.ne.s32.totalorder %s548_s6, %s392_s30  ;;  %p396_p8 = scmp.lt.u32.totalorder %s392_s30, %s548_s6 }
 0x110   :  { %p398_p9 = pnand %p396_p8, %p393_p7 }
 0x112   :  { %401 = shalt.err (!%p398_p9)
}
 0x113   :  { %254 = dma.vmem_to_hbm [thread:$0]  %s252_s27, 128, %s548_s6, [#allocation9]   ;;  %v269_v21 = vld [vmem:[%s546_s4] ss:$0 sm:$0xff] }
 0x114   :  { %s439_s15 = smov [#allocation7]  }
 0x115   :  { %s241_s16 = sshll.u32 %s439_s15, 4  ;;  %s242_s16 = int_to_ptr.vmem [resolvable:$true] %s241_s16 }
 0x116   :  { %s402_s17 = scalar_lea.vmem %s242_s16, 128  ;;  %p407_p11 = scmp.lt.s32.totalorder %s242_s16, %s242_s16 }
 0x117   :  { %p403_p10 = scmp.ne.s32.totalorder %s242_s16, %s402_s17  ;;  %p408_p12 = scmp.lt.s32.totalorder %s402_s17, %s402_s17 }
 0x119   :  { %p409_p13 = por %p408_p12, %p407_p11 }
 0x11b   :  { %p410_p0 = pnand %p409_p13, %p403_p10 }
 0x1de   :  { %v228_v22 = vpop.f32.mrb[0].mxu1 }
 0x1df   :  { %v229_v23 = vadd.f32 %v269_v21, %v228_v22  ;;  %v316_v24 = vpop.f32.mrb[1].mxu1 }
 0x1e0   :  { %v231_v25 = vpop.f32.mrb[2].mxu1 }
 0x1e1   :  { %234 = vst [vmem:[#allocation7] sm:$0xff] %v229_v23  ;;  %v317_v26 = vpop.f32.mrb[3].mxu1 }
 0x1e2   :  { %413 = shalt.err (!%p410_p0)
}
 0x1e3   :  { %s414_s4 = scalar_lea.hbm %s547_s5, 128 }
 0x1e4   :  { %p415_p1 = scmp.ne.s32.totalorder %s547_s5, %s414_s4  ;;  %p418_p2 = scmp.lt.u32.totalorder %s414_s4, %s547_s5 }
 0x1e6   :  { %p420_p3 = pnand %p418_p2, %p415_p1 }
 0x1e8   :  { %423 = shalt.err (!%p420_p3)
}
 0x1e9   :  { %244 = dma.vmem_to_hbm [thread:$0]  %s242_s16, 128, %s547_s5, [#allocation4]  }
 0x1ea   :  { %428 = dma.done.wait [#allocation4], 128  }
 0x1eb   :  { %429 = vsyncadd [#allocation4], 4294967168 }
 0x1ec   :  { %430 = dma.done.wait [#allocation9], 128  }
 0x1ed   :  { %431 = vsyncadd [#allocation9], 4294967168 }
 0x1ee   :  { %261 = vsyncpa [#allocation3], 1 }
 0x1ef   :  { %262 = vsyncpa [#allocation6], 1 }
 0x1f0   :  { %263 = vsyncpa [#allocation4], 1 }
 0x1f1   :  { %264 = vsyncpa [#allocation9], 1 }

</bundles_post_ra>
